<compile_context>
chip_gen: v7x
topology: tpu7x:2x2x1
jax: 0.10.0
libtpu: 0.0.40
codegen_flags: <defaults>
</compile_context>

<pallas_src>
import jax
import jax.numpy as jnp
from jax.experimental import pallas as pl
from jax.experimental.pallas import tpu as pltpu


# --------------------------------------------------------------------------- #
# Pallas kernel
# --------------------------------------------------------------------------- #
def _make_kernel(num_layers, nsample, tile_n, negative_slope):
    """Fused grouped-MLP (1x1 conv chain) + max over K neighbors for one tile."""

    def kernel(*refs):
        x_ref = refs[0]                                    # (1, C_in, K*TN)  bf16
        w_refs = refs[1:1 + num_layers]                    # (C_out_l, C_in_l)
        s_refs = refs[1 + num_layers:1 + 2 * num_layers]   # (C_out_l, 1) f32 shift
        out_ref = refs[1 + 2 * num_layers]                 # (1, C_out_last, TN)

        h = x_ref[0]                                       # (C_in, K*TN)

        # Hidden layers: one matmul over ALL K*TN neighbor-points per layer.
        for l in range(num_layers - 1):
            acc = jnp.dot(w_refs[l][...], h, preferred_element_type=jnp.float32)
            acc = acc + s_refs[l][...]                     # folded conv-bias / BN shift
            acc = jnp.maximum(acc, negative_slope * acc)   # LeakyReLU(0.1)
            h = acc.astype(x_ref.dtype)                    # bf16 feed to next MXU pass

        # Last layer: matmul, then max over the K neighbor segments (128-aligned
        # lane slices), then shift + LeakyReLU AFTER the max (both commute with max).
        acc = jnp.dot(w_refs[num_layers - 1][...], h,
                      preferred_element_type=jnp.float32)  # (C_out, K*TN)
        red = acc[:, 0:tile_n]
        for k in range(1, nsample):
            red = jnp.maximum(red, acc[:, k * tile_n:(k + 1) * tile_n])
        red = red + s_refs[num_layers - 1][...]
        red = jnp.maximum(red, negative_slope * red)
        out_ref[0] = red.astype(out_ref.dtype)

    return kernel


# --------------------------------------------------------------------------- #
# Shared glue helpers (identical code path for wrapper and reference)
# --------------------------------------------------------------------------- #
def _knn_indices(xyz1_t, xyz2_t, k):
    """kNN of xyz1 points among xyz2 points; Gram-matrix squared distances."""
    sq1 = jnp.sum(xyz1_t * xyz1_t, axis=-1, keepdims=True)        # [B, N1, 1]
    sq2 = jnp.sum(xyz2_t * xyz2_t, axis=-1)[:, None, :]           # [B, 1, N2]
    inner = jnp.einsum('bic,bjc->bij', xyz1_t, xyz2_t)            # [B, N1, N2]
    sqdist = sq1 + sq2 - 2.0 * inner
    _, idx = jax.lax.top_k(-sqdist, k)                            # [B, N1, K]
    return idx


def _fold_layer(w, b, bn, bn_eps):
    """Fold eval-mode BN into (weight, shift): y = x @ (w*s) + ((b-mean)*s + beta)."""
    w = w.astype(jnp.float32)
    b = b.astype(jnp.float32)
    if bn is not None:
        gamma, beta, mean, var = [p.astype(jnp.float32) for p in bn]
        s = gamma * jax.lax.rsqrt(var + bn_eps)
        w = w * s[None, :]
        b = (b - mean) * s + beta
    return w, b


# --------------------------------------------------------------------------- #
# Wrapper (Pallas hot path)
# --------------------------------------------------------------------------- #
def point_conv_cost_volume(xyz1, xyz2, points1, points2, weights, biases, bn_params,
                           nsample, *, bn_eps=1e-5, negative_slope=0.1,
                           tile_n=None, compute_dtype=jnp.bfloat16):
    """
    xyz1:    [B, 3, N1]   xyz2: [B, 3, N2]
    points1: [B, D, N1]   points2: [B, D, N2]
    weights: list of [C_in, C_out] 1x1-conv weights; biases: list of [C_out]
    bn_params: None, or list of (gamma, beta, running_mean, running_var) / None per layer
    Returns: [B, mlp[-1], N1] float32 (PyTorch layout).
    """
    B, _, N1 = xyz1.shape
    D = points1.shape[1]
    K = nsample
    num_layers = len(weights)
    C0 = 2 * D
    assert weights[0].shape[0] == C0, "first layer expects in_channel*2 channels"

    # ---- plain-JAX glue: kNN + neighbor gather + layout plumbing -------------
    xyz1_t = jnp.transpose(xyz1, (0, 2, 1)).astype(jnp.float32)   # [B, N1, 3]
    xyz2_t = jnp.transpose(xyz2, (0, 2, 1)).astype(jnp.float32)   # [B, N2, 3]
    p1_t = jnp.transpose(points1, (0, 2, 1))                      # [B, N1, D]
    p2_t = jnp.transpose(points2, (0, 2, 1))                      # [B, N2, D]

    idx = _knn_indices(xyz1_t, xyz2_t, K)                         # [B, N1, K]
    grouped_p2 = jax.vmap(lambda p, i: p[i])(p2_t, idx)           # [B, N1, K, D]
    grouped_p1 = jnp.broadcast_to(p1_t[:, :, None, :], (B, N1, K, D))
    feats = jnp.concatenate([grouped_p1, grouped_p2], axis=-1)    # [B, N1, K, C0]
    feats = feats.astype(compute_dtype)

    # N tile (lane-dense): 256 for v5e/v6e-friendly tiles, 128 fallback, else full N.
    if tile_n is None:
        tile_n = next((t for t in (256, 128) if N1 % t == 0), N1)
    assert N1 % tile_n == 0, "N1 must be divisible by tile_n"
    T = N1 // tile_n
    lanes = K * tile_n

    # Layout: [B, C0, T*(K*TN)], flat index = t*(K*TN) + k*TN + j  (j = point in tile).
    f5 = feats.reshape(B, T, tile_n, K, C0)
    g = jnp.transpose(f5, (0, 4, 1, 3, 2)).reshape(B, C0, T * lanes)

    # Fold conv bias + eval-mode BN into (transposed weight, per-channel shift).
    wts, shifts = [], []
    for l in range(num_layers):
        bn = None if bn_params is None else bn_params[l]
        w, b = _fold_layer(weights[l], biases[l], bn, bn_eps)
        wts.append(jnp.transpose(w).astype(compute_dtype))        # (C_out, C_in)
        shifts.append(b.reshape(-1, 1).astype(jnp.float32))       # (C_out, 1)
    out_c = wts[-1].shape[0]

    # ---- Pallas call ----------------------------------------------------------
    in_specs = [pl.BlockSpec((1, C0, lanes), lambda b, t: (b, 0, t))]
    for wt in wts:
        in_specs.append(pl.BlockSpec(wt.shape, lambda b, t: (0, 0)))
    for sft in shifts:
        in_specs.append(pl.BlockSpec(sft.shape, lambda b, t: (0, 0)))

    in_block_bytes = C0 * lanes * jnp.dtype(compute_dtype).itemsize
    out_block_bytes = out_c * tile_n * 4
    vmem_limit = int(min(48 * 2 ** 20,
                         max(8 * 2 ** 20, 4 * (in_block_bytes + out_block_bytes))))

    out = pl.pallas_call(
        _make_kernel(num_layers, K, tile_n, negative_slope),
        out_shape=jax.ShapeDtypeStruct((B, out_c, N1), jnp.float32),
        grid=(B, T),
        in_specs=in_specs,
        out_specs=pl.BlockSpec((1, out_c, tile_n), lambda b, t: (b, 0, t)),
        compiler_params=pltpu.CompilerParams(
            dimension_semantics=("parallel", "parallel"),
            vmem_limit_bytes=vmem_limit),
    )(g, *wts, *shifts)

    return out                                                    # [B, C_out, N1]


# --------------------------------------------------------------------------- #
# Pure-JAX reference (mirrors the PyTorch forward + the wrapper's precision)
# --------------------------------------------------------------------------- #
def _reference(xyz1, xyz2, points1, points2, weights, biases, bn_params, nsample,
               bn_eps=1e-5, negative_slope=0.1, compute_dtype=jnp.bfloat16):
    B, _, N1 = xyz1.shape
    D = points1.shape[1]
    xyz1_t = jnp.transpose(xyz1, (0, 2, 1)).astype(jnp.float32)
    xyz2_t = jnp.transpose(xyz2, (0, 2, 1)).astype(jnp.float32)
    p1_t = jnp.transpose(points1, (0, 2, 1))
    p2_t = jnp.transpose(points2, (0, 2, 1))

    idx = _knn_indices(xyz1_t, xyz2_t, nsample)
    grouped_p2 = jax.vmap(lambda p, i: p[i])(p2_t, idx)           # [B, N1, K, D]
    grouped_p1 = jnp.broadcast_to(p1_t[:, :, None, :], grouped_p2.shape)
    h = jnp.concatenate([grouped_p1, grouped_p2], axis=-1).astype(compute_dtype)

    num_layers = len(weights)
    for l in range(num_layers):
        bn = None if bn_params is None else bn_params[l]
        w, b = _fold_layer(weights[l], biases[l], bn, bn_eps)
        w = w.astype(compute_dtype)                               # same rounding as kernel
        y = jnp.einsum('bnkc,cd->bnkd', h.astype(jnp.float32), w.astype(jnp.float32),
                       preferred_element_type=jnp.float32) + b
        y = jnp.maximum(y, negative_slope * y)                    # LeakyReLU(0.1)
        h = y.astype(compute_dtype) if l < num_layers - 1 else y
    out = jnp.max(h, axis=2)                                      # [B, N1, C_out]
    return jnp.transpose(out, (0, 2, 1))                          # [B, C_out, N1]


# --------------------------------------------------------------------------- #
# Demo
# --------------------------------------------------------------------------- #
if __name__ == "__main__":
    B, C, D = 2, 3, 8          # batch, xyz channels, in_channel (feature dim)
    N1 = N2 = 512              # points per cloud
    nsample = 8                # K neighbors
    mlp = [16, 32]             # mlp_convs channel sizes

    key = jax.random.PRNGKey(0)
    key, k1, k2, k3, k4 = jax.random.split(key, 5)
    xyz1 = jax.random.normal(k1, (B, C, N1), jnp.float32)
    xyz2 = jax.random.normal(k2, (B, C, N2), jnp.float32)
    points1 = jax.random.normal(k3, (B, D, N1), jnp.float32)
    points2 = jax.random.normal(k4, (B, D, N2), jnp.float32)

    weights, biases, bn_params = [], [], []
    last = 2 * D
    for out_ch in mlp:
        key, kw, kb, kg, kbt, km, kv = jax.random.split(key, 7)
        weights.append(0.2 * jax.random.normal(kw, (last, out_ch), jnp.float32))
        biases.append(0.1 * jax.random.normal(kb, (out_ch,), jnp.float32))
        gamma = 1.0 + 0.1 * jax.random.normal(kg, (out_ch,), jnp.float32)
        beta = 0.1 * jax.random.normal(kbt, (out_ch,), jnp.float32)
        mean = 0.1 * jax.random.normal(km, (out_ch,), jnp.float32)
        var = jnp.abs(jax.random.normal(kv, (out_ch,), jnp.float32)) + 0.5
        bn_params.append((gamma, beta, mean, var))
        last = out_ch

    out = point_conv_cost_volume(xyz1, xyz2, points1, points2,
                                 weights, biases, bn_params, nsample)
    out = jax.block_until_ready(out)

    ref = jax.block_until_ready(
        _reference(xyz1, xyz2, points1, points2, weights, biases, bn_params, nsample))

    assert out.shape == (B, mlp[-1], N1), out.shape
    max_err = float(jnp.max(jnp.abs(out - ref)))
    assert jnp.allclose(out, ref, atol=1e-4, rtol=1e-4), max_err

    print("KERNEL_OK")
</pallas_src>

<mosaic_0001>
module attributes {stable_mosaic.version = 11 : i64} {
  func.func @kernel(%arg0: i32, %arg1: i32, %arg2: memref<1x16x2048xbf16, #tpu.memory_space<vmem>>, %arg3: memref<16x16xbf16, #tpu.memory_space<vmem>>, %arg4: memref<32x16xbf16, #tpu.memory_space<vmem>>, %arg5: memref<16x1xf32, #tpu.memory_space<vmem>>, %arg6: memref<32x1xf32, #tpu.memory_space<vmem>>, %arg7: memref<1x32x256xf32, #tpu.memory_space<vmem>>) attributes {dimension_semantics = [#tpu.dimension_semantics<parallel>, #tpu.dimension_semantics<parallel>], iteration_bounds = array<i64: 2, 2>, scalar_prefetch = 0 : i64, scratch_operands = 0 : i64, tpu.core_type = #tpu.core_type<tc>, window_params = [{transform_indices = @transform_0, window_bounds = array<i64: 1, 16, 2048>}, {pipeline_mode = #tpu.pipeline_mode<synchronous>, transform_indices = @transform_1, window_bounds = array<i64: 16, 16>}, {pipeline_mode = #tpu.pipeline_mode<synchronous>, transform_indices = @transform_2, window_bounds = array<i64: 32, 16>}, {pipeline_mode = #tpu.pipeline_mode<synchronous>, transform_indices = @transform_3, window_bounds = array<i64: 16, 1>}, {pipeline_mode = #tpu.pipeline_mode<synchronous>, transform_indices = @transform_4, window_bounds = array<i64: 32, 1>}, {transform_indices = @transform_5, window_bounds = array<i64: 1, 32, 256>}]} {
    %c0 = arith.constant 0 : index
    %c0_0 = arith.constant 0 : index
    %c0_1 = arith.constant 0 : index
    %0 = vector.load %arg2[%c0, %c0_0, %c0_1] : memref<1x16x2048xbf16, #tpu.memory_space<vmem>>, vector<1x16x2048xbf16>
    %1 = vector.shape_cast %0 : vector<1x16x2048xbf16> to vector<16x2048xbf16>
    %c0_2 = arith.constant 0 : index
    %c0_3 = arith.constant 0 : index
    %2 = vector.load %arg3[%c0_2, %c0_3] : memref<16x16xbf16, #tpu.memory_space<vmem>>, vector<16x16xbf16>
    %cst = arith.constant dense<0.000000e+00> : vector<16x2048xf32>
    %3 = tpu.matmul %2, %1, %cst {dimension_numbers = #tpu.dot_dimension_numbers<[1], [0], [0], [1], [0, 0, 1, 1], [], []>} : vector<16x16xbf16>, vector<16x2048xbf16>, vector<16x2048xf32> -> vector<16x2048xf32>
    %c0_4 = arith.constant 0 : index
    %c0_5 = arith.constant 0 : index
    %4 = vector.load %arg5[%c0_4, %c0_5] : memref<16x1xf32, #tpu.memory_space<vmem>>, vector<16x1xf32>
    %5 = vector.broadcast %4 : vector<16x1xf32> to vector<16x2048xf32>
    %6 = arith.addf %3, %5 : vector<16x2048xf32>
    %cst_6 = arith.constant 1.000000e-01 : f32
    %7 = vector.broadcast %cst_6 : f32 to vector<16x2048xf32>
    %8 = arith.mulf %7, %6 : vector<16x2048xf32>
    %9 = arith.maximumf %6, %8 : vector<16x2048xf32>
    %10 = arith.truncf %9 : vector<16x2048xf32> to vector<16x2048xbf16>
    %c0_7 = arith.constant 0 : index
    %c0_8 = arith.constant 0 : index
    %11 = vector.load %arg4[%c0_7, %c0_8] : memref<32x16xbf16, #tpu.memory_space<vmem>>, vector<32x16xbf16>
    %cst_9 = arith.constant dense<0.000000e+00> : vector<32x2048xf32>
    %12 = tpu.matmul %11, %10, %cst_9 {dimension_numbers = #tpu.dot_dimension_numbers<[1], [0], [0], [1], [0, 0, 1, 1], [], []>} : vector<32x16xbf16>, vector<16x2048xbf16>, vector<32x2048xf32> -> vector<32x2048xf32>
    %13 = vector.extract_strided_slice %12 {offsets = [0, 0], sizes = [32, 256], strides = [1, 1]} : vector<32x2048xf32> to vector<32x256xf32>
    %14 = vector.extract_strided_slice %12 {offsets = [0, 256], sizes = [32, 256], strides = [1, 1]} : vector<32x2048xf32> to vector<32x256xf32>
    %15 = arith.maximumf %13, %14 : vector<32x256xf32>
    %16 = vector.extract_strided_slice %12 {offsets = [0, 512], sizes = [32, 256], strides = [1, 1]} : vector<32x2048xf32> to vector<32x256xf32>
    %17 = arith.maximumf %15, %16 : vector<32x256xf32>
    %18 = vector.extract_strided_slice %12 {offsets = [0, 768], sizes = [32, 256], strides = [1, 1]} : vector<32x2048xf32> to vector<32x256xf32>
    %19 = arith.maximumf %17, %18 : vector<32x256xf32>
    %20 = vector.extract_strided_slice %12 {offsets = [0, 1024], sizes = [32, 256], strides = [1, 1]} : vector<32x2048xf32> to vector<32x256xf32>
    %21 = arith.maximumf %19, %20 : vector<32x256xf32>
    %22 = vector.extract_strided_slice %12 {offsets = [0, 1280], sizes = [32, 256], strides = [1, 1]} : vector<32x2048xf32> to vector<32x256xf32>
    %23 = arith.maximumf %21, %22 : vector<32x256xf32>
    %24 = vector.extract_strided_slice %12 {offsets = [0, 1536], sizes = [32, 256], strides = [1, 1]} : vector<32x2048xf32> to vector<32x256xf32>
    %25 = arith.maximumf %23, %24 : vector<32x256xf32>
    %26 = vector.extract_strided_slice %12 {offsets = [0, 1792], sizes = [32, 256], strides = [1, 1]} : vector<32x2048xf32> to vector<32x256xf32>
    %27 = arith.maximumf %25, %26 : vector<32x256xf32>
    %c0_10 = arith.constant 0 : index
    %c0_11 = arith.constant 0 : index
    %28 = vector.load %arg6[%c0_10, %c0_11] : memref<32x1xf32, #tpu.memory_space<vmem>>, vector<32x1xf32>
    %29 = vector.broadcast %28 : vector<32x1xf32> to vector<32x256xf32>
    %30 = arith.addf %27, %29 : vector<32x256xf32>
    %cst_12 = arith.constant 1.000000e-01 : f32
    %31 = vector.broadcast %cst_12 : f32 to vector<32x256xf32>
    %32 = arith.mulf %31, %30 : vector<32x256xf32>
    %33 = arith.maximumf %30, %32 : vector<32x256xf32>
    %c0_13 = arith.constant 0 : index
    %c0_14 = arith.constant 0 : index
    %c0_15 = arith.constant 0 : index
    %34 = vector.load %arg7[%c0_13, %c0_14, %c0_15] : memref<1x32x256xf32, #tpu.memory_space<vmem>>, vector<1x32x256xf32>
    %35 = vector.shape_cast %34 : vector<1x32x256xf32> to vector<32x256xf32>
    %36 = vector.shape_cast %33 : vector<32x256xf32> to vector<1x32x256xf32>
    tpu.vector_store %arg7[%c0_13, %c0_14, %c0_15], %36 {strides = array<i32>} : memref<1x32x256xf32, #tpu.memory_space<vmem>>, vector<1x32x256xf32>,
    return
  }
  func.func @transform_0(%arg0: i32, %arg1: i32) -> (i32, i32, i32) {
    %c0_i32 = arith.constant 0 : i32
    %c0_i32_0 = arith.constant 0 : i32
    return %arg0, %c0_i32, %arg1 : i32, i32, i32
  }
  func.func @transform_1(%arg0: i32, %arg1: i32) -> (i32, i32) {
    %c0_i32 = arith.constant 0 : i32
    %c0_i32_0 = arith.constant 0 : i32
    %c0_i32_1 = arith.constant 0 : i32
    return %c0_i32, %c0_i32_0 : i32, i32
  }
  func.func @transform_2(%arg0: i32, %arg1: i32) -> (i32, i32) {
    %c0_i32 = arith.constant 0 : i32
    %c0_i32_0 = arith.constant 0 : i32
    %c0_i32_1 = arith.constant 0 : i32
    return %c0_i32, %c0_i32_0 : i32, i32
  }
  func.func @transform_3(%arg0: i32, %arg1: i32) -> (i32, i32) {
    %c0_i32 = arith.constant 0 : i32
    %c0_i32_0 = arith.constant 0 : i32
    %c0_i32_1 = arith.constant 0 : i32
    return %c0_i32, %c0_i32_0 : i32, i32
  }
  func.func @transform_4(%arg0: i32, %arg1: i32) -> (i32, i32) {
    %c0_i32 = arith.constant 0 : i32
    %c0_i32_0 = arith.constant 0 : i32
    %c0_i32_1 = arith.constant 0 : i32
    return %c0_i32, %c0_i32_0 : i32, i32
  }
  func.func @transform_5(%arg0: i32, %arg1: i32) -> (i32, i32, i32) {
    %c0_i32 = arith.constant 0 : i32
    %c0_i32_0 = arith.constant 0 : i32
    return %arg0, %c0_i32, %arg1 : i32, i32, i32
  }
}

</mosaic_0001>

<bundles_post_ra>
// kernel: tpu_custom_call.1
= control target key start
LH: loop header
LB: loop body
LE: loop exit
PB: predicated region body
PF: predicated region fallthrough
CT: control target
= control target key end

     0   :  { %10 = vsyncpa [#allocation3], 0  ;;  %s2148_s0 = inlined_call_operand.hbm [shape: bf16[2,16,4096], index: 0, kind: input, shape index: {}]   ;;  %s2149_s1 = inlined_call_operand.vmem [shape: bf16[16,16], index: 1, kind: input, shape index: {}]   ;;  %s2150_s2 = inlined_call_operand.vmem [shape: bf16[32,16], index: 2, kind: input, shape index: {}]   ;;  %s2151_s3 = inlined_call_operand.vmem [shape: f32[16,1], index: 3, kind: input, shape index: {}]   ;;  %s2152_s4 = inlined_call_operand.vmem [shape: f32[32,1], index: 4, kind: input, shape index: {}]   ;;  %s2153_s5 = inlined_call_operand.hbm [shape: f32[2,32,512], index: 5, kind: output, shape index: {}]  }
   0x1   :  { %12 = vsyncpa [#allocation3 + $0x1], 0 }
   0x2   :  { %13 = vsyncpa [#allocation4], 0 }
   0x3   :  { %15 = vsyncpa [#allocation4 + $0x1], 0  ;;  %s1788_s18 = smov 0   ;;  %s1790_s19 = smov 0  }
   0x4   :  { %s1792_s20 = smov 0   ;;  %s1794_s21 = smov 0  }
   0x5   :  { %s1796_s22 = smov 0   ;;  %s1798_s23 = smov 0  }
   0x6   :  { %s1800_s24 = smov 0   ;;  %s1802_s25 = smov 0  }
   0x7 LB: > { %2157 = sst [smem:[#allocation8_spill]] %s1719_s18  ;;  %s1469_s26 = sadd.s32 4294967295, %s1747_s25   ;;  %s1747_s25 = sphi %s1802_s25, %s21_s25   ;;  %s1743_s24 = sphi %s1800_s24, %s2175_s24   ;;  %s1739_s23 = sphi %s1798_s23, %s2174_s23   ;;  %s1735_s22 = sphi %s1796_s22, %s2173_s22   ;;  %s1731_s21 = sphi %s1794_s21, %s2172_s21   ;;  %s1727_s20 = sphi %s1792_s20, %s2171_s20   ;;  %s1723_s19 = sphi %s1790_s19, %s2170_s19   ;;  %s1719_s18 = sphi %s1788_s18, %s2169_s18  }
   0x8   : > { %s1470_s27 = sadd.s32 4294967294, %s1747_s25   ;;  %s30_s28 = sadd.s32 1, %s1739_s23 }
   0x9   : > { %s33_s29 = sadd.s32 1, %s1743_s24  ;;  %p31_p0 = scmp.ge.s32.totalorder %s30_s28, 2 }
   0xa   : > { %s42_s30 = sadd.s32 1, %s1727_s20  ;;  %p49_p1 = scmp.ne.s32.totalorder %s1727_s20, %s1723_s19 }
   0xb   : > { %p50_p2 = scmp.eq.s32.totalorder %s1747_s25, 0  ;;  %s2177_s28 = smov (%p31_p0, %s30_s28), 0 }
   0xc   : > { %2158 = sst [smem:[#allocation9_spill]] %s2177_s28  ;;  %s2179_s29 = smov (!%p31_p0, %s33_s29), %s1743_s24 }
   0xd   : > { %s38_s6 = ssub.s32 %s1739_s23, %s2177_s28  ;;  %p1841_p3 = por %p50_p2, %p49_p1 }
   0xe   : > { %p35_p4 = scmp.ge.s32.totalorder %s2179_s29, 2  ;;  %p55_p5 = scmp.ne.s32.totalorder %s1723_s19, %s1719_s18 }
   0xf   : > { %p56_p6 = scmp.eq.s32.totalorder %s1469_s26, 0  ;;  %p165_p7 = scmp.eq.s32.totalorder %s1469_s26, 3 }
  0x10   : > { %s2181_s29 = smov (%p35_p4, %s2179_s29), 0  ;;  %p171_p10 = scmp.eq.s32.totalorder %s1470_s27, 3 }
  0x11   : > { %p1849_p8 = por %p56_p6, %p55_p5  ;;  %p1853_p9 = por %p165_p7, %p49_p1 }
  0x12   : > { %s37_s10 = ssub.s32 %s1743_s24, %s2181_s29  ;;  %p1859_p12 = por %p171_p10, %p55_p5 }
  0x13   : > { %s2161_s9 = scalar_select %p1853_p9, 1, 0 }
  0x14   : > { %s39_s11 = sor.u32 %s38_s6, %s37_s10  ;;  %p1541_p13 = scmp.lt.s32.totalorder %s1747_s25, 4 }
  0x15   : > { %p40_p11 = scmp.eq.s32.totalorder %s39_s11, 0  ;;  %s203_s13 = sand.u32 1, %s1727_s20  }
  0x16   : > { %s2162_s12 = scalar_select %p1859_p12, 1, 0 }
  0x17   : > { %s1866_s14 = scalar_select %p40_p11, %s1727_s20, %s42_s30  }
  0x18   : > { %s1473_s15 = sshll.u32 %s203_s13, 7  ;;  %s1474_s16 = sshll.u32 %s1739_s23, 4 }
  0x19   : > { %s1475_s17 = sshll.u32 %s1743_s24, 6  ;;  %s207_s26 = scalar_lea.vmem [#allocation2], %s1473_s15 }
  0x1a   : > { %s216_s28 = sshll.u32 %s207_s26, 4  ;;  %s213_s18 = sadd.s32 %s1475_s17, %s1474_s16  ;;  %s1870_s28 = int_to_ptr.vmem [resolvable:$true] %s216_s28 }
  0x1b   : > { %s1476_s27 = sshll.u32 %s213_s18, 6  ;;  %p1874_p0 = pnand %p1541_p13, %p1841_p3 }
  0x1c   : > { %s1881_s30 = scalar_lea.hbm %s2148_s0, %s1476_s27  ;;  %s1884_s15 = scalar_lea.sflag [#allocation3], %s203_s13 }
  0x1d   : > { %s1619_s18 = scalar_lea.hbm %s1881_s30, 2048  ;;  %p1621_p3 = pneg %p1874_p0 }
  0x1e   : > { %p1620_p2 = scmp.ne.s32.totalorder %s1881_s30, %s1619_s18  ;;  %s1624_s17 = scalar_lea.hbm %s2148_s0, 8192 }
  0x1f   : > { %p1625_p6 = scmp.lt.u32.totalorder %s1881_s30, %s2148_s0  ;;  %p1626_p7 = scmp.lt.u32.totalorder %s1624_s17, %s1619_s18 }
  0x20   : > { %p1622_p4 = pnand %p1621_p3, %p1620_p2  ;;  %p1628_p11 = scmp.lt.u32.totalorder %s1619_s18, %s1881_s30 }
  0x21   : > { %p1627_p10 = por %p1626_p7, %p1625_p6 }
  0x22   : > { %p1623_p5 = pneg %p1622_p4 }
  0x23   : > { %p1629_p13 = por %p1628_p11, %p1627_p10 }
  0x25   : > { %p1630_p1 = pnand %p1629_p13, %p1623_p5 }
  0x27   : > { %1633 = shalt.err (!%p1630_p1)
}
  0x28   : > { %s1634_s13 = scalar_lea.vmem %s1870_s28, 2048  ;;  %s1749_s10 = smov [#allocation2]  }
  0x29   : > { %p1635_p2 = scmp.ne.s32.totalorder %s1870_s28, %s1634_s13  ;;  %s1639_s11 = sshll.u32 %s1749_s10, 4  ;;  %s1640_s11 = int_to_ptr.vmem [resolvable:$false] %s1639_s11 }
  0x2a   : > { %s1641_s7 = scalar_lea.vmem %s1640_s11, 4096  ;;  %p1642_p9 = scmp.lt.s32.totalorder %s1870_s28, %s1640_s11 }
  0x2b   : > { %p1637_p4 = pnand %p1635_p2, %p1621_p3  ;;  %p1643_p6 = scmp.lt.s32.totalorder %s1641_s7, %s1634_s13 }
  0x2d   : > { %p1638_p12 = pneg %p1637_p4  ;;  %p1644_p7 = por %p1643_p6, %p1642_p9 }
  0x2f   : > { %p1645_p10 = pnand %p1644_p7, %p1638_p12 }
  0x31   : > { %1648 = shalt.err (!%p1645_p10)
}
  0x32   : > { %s1750_s18 = smov 2048   ;;  %s1751_s16 = smov 1024  }
  0x33   : > { %s1752_s17 = smov 64   ;;  %p224_p1 = scmp.lt.s32.totalorder %s1747_s25, 5 }
  0x34   : > { %1536 = dma.hbm_to_vmem [thread:$0]  (!%p1874_p0), %s1881_s30, 2048, %s1870_s28, %s1884_s15, %s1750_s18, %s1751_s16, %s1752_s17  }
  0x35   : > { %p2164_p3 = scmp.ge.s32.totalorder %s1747_s25, 1 }
  0x37   : > { %p225_p5 = pnand %p2164_p3, %p224_p1 }
  0x38   : > { %s1916_s26 = sand.u32 (!%p225_p5), 1, %s1723_s19  }
  0x39   : > { %228 = sbr.rel (%p225_p5) target bundleno = 597 (0x255), region = 40  ;;  %s1478_s27 = sshll.u32 (!%p225_p5), %s1916_s26, 7 }
  0x3a   : > { %s231_s13 = scalar_lea.sflag (!%p225_p5), [#allocation3], %s1916_s26  ;;  %s1920_s10 = scalar_lea.vmem (!%p225_p5), [#allocation2], %s1478_s27 }
  0x40   : > { %1710 = dma.done.wait (%p1849_p8), %s231_s13, 2048  }
  0x41   : > { %1712 = vsyncadd (%p1849_p8), %s231_s13, 4294965248  ;;  %v1753_v0 = vmov 0   ;;  %v264_v1 = vld [vmem:[%s1920_s10] sm:$0xff]  ;;  %v265_v3 = vld [vmem:[%s1920_s10 + $0x8] sm:$0xff]  ;;  %vm379_vm0 = vcmask 130048   ;;  %s1479_s11 = sshll.u32 %s1916_s26, 6 }
  0x42   : > { %415 = vmatprep.mubr.bf16.mxu0 %v1753_v0  ;;  %458 = vmatprep.mubr.bf16.mxu1 %v1753_v0  ;;  %v272_v2 = vld [vmem:[%s1920_s10 + $0x40] sm:$0xff]  ;;  %v273_v5 = vld [vmem:[%s1920_s10 + $0x48] sm:$0xff]  ;;  %v266_v10 = vld [vmem:[%s1920_s10 + $0x10] sm:$0xff]  ;;  %s1524_s7 = sshll.u32 %s1731_s21, 1  ;;  %s1525_s18 = sshll.u32 %s1735_s22, 4 }
  0x43   : > { %1614 = vset.pattern.permute.xlu0 %v1753_v0  ;;  %1615 = vset.pattern.permute.xlu1 %v1753_v0  ;;  %v1482_v4 = vcombine.high %v264_v1, %v272_v2  ;;  %v1481_v6 = vcombine.low %v264_v1, %v272_v2  ;;  %v1484_v7 = vcombine.high %v265_v3, %v273_v5  ;;  %v1616_v9 = vld [vmem:[%s2149_s1] sm:$0xff]   ;;  %v274_v11 = vld [vmem:[%s1920_s10 + $0x50] sm:$0xff]  ;;  %v267_v13 = vld [vmem:[%s1920_s10 + $0x18] sm:$0xff]  ;;  %s2078_s16 = scalar_lea.vmem [#allocation5], %s1479_s11  ;;  %s1376_s21 = sadd.s32 %s1525_s18, %s1524_s7 }
  0x44   : > { %v1483_v8 = vcombine.low %v265_v3, %v273_v5  ;;  %v1486_v12 = vcombine.high %v266_v10, %v274_v11  ;;  %v275_v14 = vld [vmem:[%s1920_s10 + $0x58] sm:$0xff]  ;;  %v268_v15 = vld [vmem:[%s1920_s10 + $0x20] sm:$0xff]  ;;  %v1485_v16 = vcombine.low %v266_v10, %v274_v11  ;;  %v269_v19 = vld [vmem:[%s1920_s10 + $0x28] sm:$0xff]  ;;  %s1379_s22 = sshll.u32 %s2078_s16, 4  ;;  %s1526_s17 = sshll.u32 %s1376_s21, 7  ;;  %s2085_s22 = int_to_ptr.vmem [resolvable:$true] %s1379_s22 }
  0x45   : > { %383 = vmatprep.subr.bf16.mxu0 %v1482_v4  ;;  %426 = vmatprep.subr.bf16.mxu1 %v1484_v7  ;;  %v1488_v17 = vcombine.high %v267_v13, %v275_v14  ;;  %v276_v18 = vld [vmem:[%s1920_s10 + $0x60] sm:$0xff]  ;;  %v277_v20 = vld [vmem:[%s1920_s10 + $0x68] sm:$0xff]  ;;  %v1487_v21 = vcombine.low %v267_v13, %v275_v14  ;;  %v270_v26 = vld [vmem:[%s1920_s10 + $0x30] sm:$0xff]  ;;  %s1364_s28 = scalar_lea.sflag [#allocation4], %s1916_s26  ;;  %s1649_s8 = scalar_lea.vmem %s2085_s22, 1024 }
  0x46   : > { %384 = vmatpush1.bf16.msra.mxu0 %v1481_v6  ;;  %427 = vmatpush1.bf16.msra.mxu1 %v1483_v8  ;;  %v1490_v22 = vcombine.high %v268_v15, %v276_v18  ;;  %v282_v23 = vld [vmem:[%s2151_s3] sm:$0xff]  ;;  %v1492_v24 = vcombine.high %v269_v19, %v277_v20  ;;  %v283_v25 = vld [vmem:[%s2151_s3 + $0x8] sm:$0xff]  ;;  %v278_v27 = vld [vmem:[%s1920_s10 + $0x70] sm:$0xff]  ;;  %v1489_v28 = vcombine.low %v268_v15, %v276_v18  ;;  %p1650_p8 = scmp.ne.s32.totalorder %s2085_s22, %s1649_s8  ;;  %p2165_p9 = scmp.ne.s32.totalorder %s2161_s9, 0 }
  0x47   : > { %469 = vmatprep.subr.bf16.mxu0 %v1486_v12  ;;  %512 = vmatprep.subr.bf16.mxu1 %v1488_v17  ;;  %v271_v29 = vld [vmem:[%s1920_s10 + $0x38] sm:$0xff]  ;;  %v1309_v31 = vld [vmem:[%s2152_s4 + $0x10] sm:$0xff]  ;;  %v1491_v32 = vcombine.low %v269_v19, %v277_v20  ;;  %v1494_v33 = vcombine.high %v270_v26, %v278_v27  ;;  %v1493_v35 = vcombine.low %v270_v26, %v278_v27  ;;  %v1307_v37 = vld [vmem:[%s2152_s4] sm:$0xff]  ;;  %s1754_s6 = smov [#allocation5]  }
  0x48   : > { %286 = vperm.xlu0 %1614, %v282_v23   ;;  %v279_v30 = vld [vmem:[%s1920_s10 + $0x78] sm:$0xff]  ;;  %1313 = vperm.xlu1 %1615, %v1307_v37   ;;  %v1308_v38 = vld [vmem:[%s2152_s4 + $0x8] sm:$0xff]  ;;  %s2091_s10 = scalar_lea.hbm %s2153_s5, %s1526_s17  ;;  %p1651_p12 = pnand %p1650_p8, %p2165_p9 }
  0x49   : > { %1497 = vmatmul.mubr.msk.bf16.vlgmr.msra.gmra.mrb[0].mxu0 %vm379_vm0, %v1616_v9  ;;  %1498 = vmatmul.mubr.msk.bf16.vlgmr.msra.gmra.mrb[0].mxu1 %vm379_vm0, %v1616_v9  ;;  %v1496_v34 = vcombine.high %v271_v29, %v279_v30  ;;  %v1495_v36 = vcombine.low %v271_v29, %v279_v30  ;;  %v1310_v39 = vld [vmem:[%s2152_s4 + $0x18] sm:$0xff]  ;;  %s1653_s30 = sshll.u32 %s1754_s6, 4  ;;  %s1654_s30 = int_to_ptr.vmem [resolvable:$false] %s1653_s30 }
  0x4a   : > { %470 = vmatpush1.bf16.msra.mxu0 %v1485_v16  ;;  %513 = vmatpush1.bf16.msra.mxu1 %v1487_v21  ;;  %p1652_p0 = pneg %p1651_p12  ;;  %s1655_s15 = scalar_lea.vmem %s1654_s30, 2048 }
  0x4b   : > { %501 = vmatprep.mubr.bf16.mxu0 %v1753_v0  ;;  %544 = vmatprep.mubr.bf16.mxu1 %v1753_v0  ;;  %p1656_p11 = scmp.lt.s32.totalorder %s2085_s22, %s1654_s30  ;;  %p1657_p13 = scmp.lt.s32.totalorder %s1655_s15, %s1649_s8 }
  0x4c   : > { %555 = vmatprep.subr.bf16.mxu0 %v1490_v22  ;;  %598 = vmatprep.subr.bf16.mxu1 %v1492_v24 }
  0x4d   : > { %291 = vperm.xlu0 %1614, %v283_v25   ;;  %1318 = vperm.xlu1 %1615, %v1308_v38   ;;  %p1658_p2 = por %p1657_p13, %p1656_p11 }
  0x4f   : > { %p1659_p4 = pnand %p1658_p2, %p1652_p0 }
  0x51   : > { %1499 = vmatmul.mubr.msk.bf16.vlgmr.msra.gmra.mrb[4].mxu0 %vm379_vm0, %v1616_v9  ;;  %1323 = vperm.xlu0 %1614, %v1309_v31  }
  0x52   : > { %1500 = vmatmul.mubr.msk.bf16.vlgmr.msra.gmra.mrb[4].mxu1 %vm379_vm0, %v1616_v9  ;;  %556 = vmatpush1.bf16.msra.mxu0 %v1489_v28 }
  0x53   : > { %599 = vmatpush1.bf16.msra.mxu1 %v1491_v32  ;;  %587 = vmatprep.mubr.bf16.mxu0 %v1753_v0 }
  0x54   : > { %630 = vmatprep.mubr.bf16.mxu1 %v1753_v0  ;;  %641 = vmatprep.subr.bf16.mxu0 %v1494_v33  ;;  %v2005_v33 = vld [vmem:[%s2150_s2] sm:$0xff]  }
  0x55   : > { %684 = vmatprep.subr.bf16.mxu1 %v1496_v34  ;;  %1328 = vperm.xlu1 %1615, %v1310_v39  }
  0x59   : > { %1501 = vmatmul.mubr.msk.bf16.vlgmr.msra.gmra.mrb[8].mxu0 %vm379_vm0, %v1616_v9 }
  0x5a   : > { %1502 = vmatmul.mubr.msk.bf16.vlgmr.msra.gmra.mrb[8].mxu1 %vm379_vm0, %v1616_v9  ;;  %642 = vmatpush1.bf16.msra.mxu0 %v1493_v35 }
  0x5b   : > { %685 = vmatpush1.bf16.msra.mxu1 %v1495_v36  ;;  %673 = vmatprep.mubr.bf16.mxu0 %v1753_v0 }
  0x5c   : > { %716 = vmatprep.mubr.bf16.mxu1 %v1753_v0 }
  0x61   : > { %1503 = vmatmul.mubr.msk.bf16.vlgmr.msra.gmra.mrb[12].mxu0 %vm379_vm0, %v1616_v9 }
  0x62   : > { %1504 = vmatmul.mubr.msk.bf16.vlgmr.msra.gmra.mrb[12].mxu1 %vm379_vm0, %v1616_v9  ;;  %859 = vmatprep.mubr.bf16.mxu0 %v1753_v0 }
  0x63   : > { %912 = vmatprep.mubr.bf16.mxu1 %v1753_v0 }
  0xc7   : > { %v1983_v40 = vpop.permute.xlu0 %286 }
  0xcc   : > { %v1985_v41 = vpop.permute.xlu0 %291 }
 0x11c   : > { %v417_v42 = vpop.f32.mrb[0].mxu0  ;;  %v460_v44 = vpop.f32.mrb[0].mxu1 }
 0x11d   : > { %v418_v43 = vadd.f32 %v417_v42, %v1983_v40  ;;  %v419_v45 = vpop.f32.mrb[1].mxu0  ;;  %v461_v46 = vadd.f32 %v460_v44, %v1983_v40  ;;  %v462_v48 = vpop.f32.mrb[1].mxu1 }
 0x11e   : > { %v420_v47 = vadd.f32 %v419_v45, %v1983_v40  ;;  %v421_v49 = vpop.f32.mrb[2].mxu0  ;;  %v463_v51 = vadd.f32 %v462_v48, %v1983_v40  ;;  %v464_v53 = vpop.f32.mrb[2].mxu1 }
 0x11f   : > { %v727_v50 = vmul.f32 0.1, %v418_v43  ;;  %v422_v52 = vadd.f32 %v421_v49, %v1985_v41  ;;  %v423_v54 = vpop.f32.mrb[3].mxu0  ;;  %v729_v55 = vmul.f32 0.1, %v461_v46  ;;  %v465_v57 = vadd.f32 %v464_v53, %v1985_v41  ;;  %v466_v59 = vpop.f32.mrb[3].mxu1 }
 0x120   : > { %v728_v56 = vmul.f32 0.1, %v420_v47  ;;  %v424_v58 = vadd.f32 %v423_v54, %v1985_v41  ;;  %v730_v60 = vmul.f32 0.1, %v463_v51  ;;  %v467_v62 = vadd.f32 %v466_v59, %v1985_v41 }
 0x121   : > { %v743_v61 = vmul.f32 0.1, %v422_v52  ;;  %v745_v63 = vmul.f32 0.1, %v465_v57  ;;  %v759_v2 = vmax.f32 %v418_v43, %v727_v50  ;;  %v761_v5 = vmax.f32 %v461_v46, %v729_v55 }
 0x122   : > { %v744_v1 = vmul.f32 0.1, %v424_v58  ;;  %v746_v4 = vmul.f32 0.1, %v467_v62  ;;  %v760_v6 = vmax.f32 %v420_v47, %v728_v56  ;;  %v762_v10 = vmax.f32 %v463_v51, %v730_v60 }
 0x123   : > { %v775_v3 = vmax.f32 %v422_v52, %v743_v61  ;;  %v777_v7 = vmax.f32 %v465_v57, %v745_v63 }
 0x124   : > { %v776_v8 = vmax.f32 %v424_v58, %v744_v1  ;;  %v503_v9 = vpop.f32.mrb[4].mxu0  ;;  %v778_v12 = vmax.f32 %v467_v62, %v746_v4 }
 0x125   : > { %v791_v11 = vpack.c.bf16 %v775_v3, %v759_v2  ;;  %v504_v13 = vadd.f32 %v503_v9, %v1983_v40  ;;  %v546_v14 = vpop.f32.mrb[4].mxu1  ;;  %v505_v15 = vpop.f32.mrb[5].mxu0  ;;  %v793_v16 = vpack.c.bf16 %v777_v7, %v761_v5  ;;  %v2024_v9 = vld [vmem:[%s2150_s2 + $0x8] sm:$0xff]  }
 0x126   : > { %v547_v17 = vadd.f32 %v546_v14, %v1983_v40  ;;  %v506_v18 = vadd.f32 %v505_v15, %v1983_v40  ;;  %v548_v19 = vpop.f32.mrb[5].mxu1  ;;  %v507_v20 = vpop.f32.mrb[6].mxu0  ;;  %v792_v21 = vpack.c.bf16 %v776_v8, %v760_v6  ;;  %v794_v27 = vpack.c.bf16 %v778_v12, %v762_v10 }
 0x127   : > { %v731_v22 = vmul.f32 0.1, %v504_v13  ;;  %v549_v23 = vadd.f32 %v548_v19, %v1983_v40  ;;  %v508_v24 = vadd.f32 %v507_v20, %v1985_v41  ;;  %v550_v25 = vpop.f32.mrb[6].mxu1  ;;  %v509_v26 = vpop.f32.mrb[7].mxu0 }
 0x128   : > { %v733_v28 = vmul.f32 0.1, %v547_v17  ;;  %v732_v29 = vmul.f32 0.1, %v506_v18  ;;  %v551_v30 = vadd.f32 %v550_v25, %v1985_v41  ;;  %v510_v31 = vadd.f32 %v509_v26, %v1985_v41  ;;  %v552_v32 = vpop.f32.mrb[7].mxu1  ;;  %827 = vmatprep.subr.bf16.mxu0 %v792_v21  ;;  %880 = vmatprep.subr.bf16.mxu1 %v794_v27 }
 0x129   : > { %v734_v34 = vmul.f32 0.1, %v549_v23  ;;  %v747_v35 = vmul.f32 0.1, %v508_v24  ;;  %v553_v36 = vadd.f32 %v552_v32, %v1985_v41  ;;  %828 = vmatpush1.bf16.msra.mxu0 %v791_v11  ;;  %881 = vmatpush1.bf16.msra.mxu1 %v793_v16  ;;  %v763_v39 = vmax.f32 %v504_v13, %v731_v22 }
 0x12a   : > { %v749_v37 = vmul.f32 0.1, %v551_v30  ;;  %v748_v38 = vmul.f32 0.1, %v510_v31  ;;  %v765_v42 = vmax.f32 %v547_v17, %v733_v28  ;;  %v764_v45 = vmax.f32 %v506_v18, %v732_v29 }
 0x12b   : > { %v779_v43 = vmax.f32 %v508_v24, %v747_v35  ;;  %v750_v44 = vmul.f32 0.1, %v553_v36  ;;  %v766_v46 = vmax.f32 %v549_v23, %v734_v34 }
 0x12c   : > { %v781_v47 = vmax.f32 %v551_v30, %v749_v37  ;;  %v780_v48 = vmax.f32 %v510_v31, %v748_v38  ;;  %v589_v49 = vpop.f32.mrb[8].mxu0  ;;  %1507 = vmatmul.mubr.msk.bf16.vlgmr.msra.gmra.mrb[16].mxu0 %vm379_vm0, %v2005_v33  ;;  %1509 = vmatmul.mubr.msk.bf16.vlgmr.msra.gmra.mrb[16].mxu1 %vm379_vm0, %v2005_v33 }
 0x12d   : > { %v795_v50 = vpack.c.bf16 %v779_v43, %v763_v39  ;;  %v782_v51 = vmax.f32 %v553_v36, %v750_v44  ;;  %v590_v52 = vadd.f32 %v589_v49, %v1983_v40  ;;  %v632_v53 = vpop.f32.mrb[8].mxu1  ;;  %v591_v54 = vpop.f32.mrb[9].mxu0  ;;  %869 = vmatprep.mubr.bf16.mxu0 %v1753_v0  ;;  %922 = vmatprep.mubr.bf16.mxu1 %v1753_v0 }
 0x12e   : > { %v797_v55 = vpack.c.bf16 %v781_v47, %v765_v42  ;;  %v633_v56 = vadd.f32 %v632_v53, %v1983_v40  ;;  %v592_v57 = vadd.f32 %v591_v54, %v1983_v40  ;;  %v634_v58 = vpop.f32.mrb[9].mxu1  ;;  %v593_v59 = vpop.f32.mrb[10].mxu0  ;;  %v796_v60 = vpack.c.bf16 %v780_v48, %v764_v45 }
 0x12f   : > { %v735_v61 = vmul.f32 0.1, %v590_v52  ;;  %v635_v62 = vadd.f32 %v634_v58, %v1983_v40  ;;  %v594_v63 = vadd.f32 %v593_v59, %v1985_v41  ;;  %v636_v1 = vpop.f32.mrb[10].mxu1  ;;  %v595_v2 = vpop.f32.mrb[11].mxu0  ;;  %v798_v3 = vpack.c.bf16 %v782_v51, %v766_v46 }
 0x130   : > { %v737_v4 = vmul.f32 0.1, %v633_v56  ;;  %v736_v5 = vmul.f32 0.1, %v592_v57  ;;  %v637_v6 = vadd.f32 %v636_v1, %v1985_v41  ;;  %v596_v7 = vadd.f32 %v595_v2, %v1985_v41  ;;  %v638_v8 = vpop.f32.mrb[11].mxu1  ;;  %933 = vmatprep.subr.bf16.mxu0 %v796_v60 }
 0x131   : > { %v738_v10 = vmul.f32 0.1, %v635_v62  ;;  %v751_v11 = vmul.f32 0.1, %v594_v63  ;;  %v639_v12 = vadd.f32 %v638_v8, %v1985_v41  ;;  %986 = vmatprep.subr.bf16.mxu1 %v798_v3  ;;  %934 = vmatpush1.bf16.msra.mxu0 %v795_v50  ;;  %v767_v15 = vmax.f32 %v590_v52, %v735_v61 }
 0x132   : > { %v753_v13 = vmul.f32 0.1, %v637_v6  ;;  %v752_v14 = vmul.f32 0.1, %v596_v7  ;;  %987 = vmatpush1.bf16.msra.mxu1 %v797_v55  ;;  %v769_v16 = vmax.f32 %v633_v56, %v737_v4  ;;  %v768_v19 = vmax.f32 %v592_v57, %v736_v5 }
 0x133   : > { %v783_v17 = vmax.f32 %v594_v63, %v751_v11  ;;  %v754_v18 = vmul.f32 0.1, %v639_v12  ;;  %v770_v20 = vmax.f32 %v635_v62, %v738_v10 }
 0x134   : > { %v785_v21 = vmax.f32 %v637_v6, %v753_v13  ;;  %v784_v22 = vmax.f32 %v596_v7, %v752_v14  ;;  %v675_v23 = vpop.f32.mrb[12].mxu0  ;;  %1508 = vmatmul.mubr.msk.bf16.gmra.mrb[20].mxu0 %vm379_vm0, %v2024_v9  ;;  %1510 = vmatmul.mubr.msk.bf16.gmra.mrb[20].mxu1 %vm379_vm0, %v2024_v9 }
 0x135   : > { %v799_v24 = vpack.c.bf16 %v783_v17, %v767_v15  ;;  %v786_v25 = vmax.f32 %v639_v12, %v754_v18  ;;  %v676_v26 = vadd.f32 %v675_v23, %v1983_v40  ;;  %v718_v27 = vpop.f32.mrb[12].mxu1  ;;  %v677_v28 = vpop.f32.mrb[13].mxu0  ;;  %965 = vmatprep.mubr.bf16.mxu0 %v1753_v0  ;;  %1018 = vmatprep.mubr.bf16.mxu1 %v1753_v0 }
 0x136   : > { %v801_v29 = vpack.c.bf16 %v785_v21, %v769_v16  ;;  %v719_v30 = vadd.f32 %v718_v27, %v1983_v40  ;;  %v678_v31 = vadd.f32 %v677_v28, %v1983_v40  ;;  %v720_v32 = vpop.f32.mrb[13].mxu1  ;;  %v679_v34 = vpop.f32.mrb[14].mxu0  ;;  %v800_v35 = vpack.c.bf16 %v784_v22, %v768_v19 }
 0x137   : > { %v739_v36 = vmul.f32 0.1, %v676_v26  ;;  %v721_v37 = vadd.f32 %v720_v32, %v1983_v40  ;;  %v680_v38 = vadd.f32 %v679_v34, %v1985_v41  ;;  %v722_v39 = vpop.f32.mrb[14].mxu1  ;;  %v681_v42 = vpop.f32.mrb[15].mxu0  ;;  %v802_v43 = vpack.c.bf16 %v786_v25, %v770_v20 }
 0x138   : > { %v741_v44 = vmul.f32 0.1, %v719_v30  ;;  %v740_v45 = vmul.f32 0.1, %v678_v31  ;;  %v723_v46 = vadd.f32 %v722_v39, %v1985_v41  ;;  %v682_v47 = vadd.f32 %v681_v42, %v1985_v41  ;;  %v724_v48 = vpop.f32.mrb[15].mxu1  ;;  %1039 = vmatprep.subr.bf16.mxu0 %v800_v35 }
 0x139   : > { %v742_v49 = vmul.f32 0.1, %v721_v37  ;;  %v755_v50 = vmul.f32 0.1, %v680_v38  ;;  %v725_v51 = vadd.f32 %v724_v48, %v1985_v41  ;;  %1092 = vmatprep.subr.bf16.mxu1 %v802_v43  ;;  %v771_v53 = vmax.f32 %v676_v26, %v739_v36 }
 0x13a   : > { %v757_v52 = vmul.f32 0.1, %v723_v46  ;;  %v756_v40 = vmul.f32 0.1, %v682_v47  ;;  %v773_v56 = vmax.f32 %v719_v30, %v741_v44  ;;  %v772_v57 = vmax.f32 %v678_v31, %v740_v45 }
 0x13b   : > { %v787_v54 = vmax.f32 %v680_v38, %v755_v50  ;;  %v758_v55 = vmul.f32 0.1, %v725_v51  ;;  %v774_v60 = vmax.f32 %v721_v37, %v742_v49 }
 0x13c   : > { %v789_v58 = vmax.f32 %v723_v46, %v757_v52  ;;  %v788_v59 = vmax.f32 %v682_v47, %v756_v40  ;;  %1511 = vmatmul.mubr.msk.bf16.vlgmr.msra.gmra.mrb[24].mxu0 %vm379_vm0, %v2005_v33  ;;  %1513 = vmatmul.mubr.msk.bf16.vlgmr.msra.gmra.mrb[24].mxu1 %vm379_vm0, %v2005_v33 }
 0x13d   : > { %v803_v61 = vpack.c.bf16 %v787_v54, %v771_v53  ;;  %v790_v62 = vmax.f32 %v725_v51, %v758_v55  ;;  %1040 = vmatpush1.bf16.msra.mxu0 %v799_v24  ;;  %1093 = vmatpush1.bf16.msra.mxu1 %v801_v29 }
 0x13e   : > { %v805_v41 = vpack.c.bf16 %v789_v58, %v773_v56  ;;  %v804_v63 = vpack.c.bf16 %v788_v59, %v772_v57  ;;  %975 = vmatprep.mubr.bf16.mxu0 %v1753_v0  ;;  %1028 = vmatprep.mubr.bf16.mxu1 %v1753_v0 }
 0x13f   : > { %v806_v1 = vpack.c.bf16 %v790_v62, %v774_v60 }
 0x140   : > { %1145 = vmatprep.subr.bf16.mxu0 %v804_v63 }
 0x141   : > { %1198 = vmatprep.subr.bf16.mxu1 %v806_v1 }
 0x144   : > { %1512 = vmatmul.mubr.msk.bf16.gmra.mrb[28].mxu0 %vm379_vm0, %v2024_v9  ;;  %1514 = vmatmul.mubr.msk.bf16.gmra.mrb[28].mxu1 %vm379_vm0, %v2024_v9 }
 0x145   : > { %1071 = vmatprep.mubr.bf16.mxu0 %v1753_v0  ;;  %1124 = vmatprep.mubr.bf16.mxu1 %v1753_v0 }
 0x14c   : > { %1515 = vmatmul.mubr.msk.bf16.vlgmr.msra.gmra.mrb[32].mxu0 %vm379_vm0, %v2005_v33  ;;  %1517 = vmatmul.mubr.msk.bf16.vlgmr.msra.gmra.mrb[32].mxu1 %vm379_vm0, %v2005_v33 }
 0x14d   : > { %1146 = vmatpush1.bf16.msra.mxu0 %v803_v61  ;;  %1199 = vmatpush1.bf16.msra.mxu1 %v805_v41 }
 0x14e   : > { %1081 = vmatprep.mubr.bf16.mxu0 %v1753_v0  ;;  %1134 = vmatprep.mubr.bf16.mxu1 %v1753_v0 }
 0x154   : > { %1516 = vmatmul.mubr.msk.bf16.gmra.mrb[36].mxu0 %vm379_vm0, %v2024_v9  ;;  %1518 = vmatmul.mubr.msk.bf16.gmra.mrb[36].mxu1 %vm379_vm0, %v2024_v9 }
 0x155   : > { %1177 = vmatprep.mubr.bf16.mxu0 %v1753_v0  ;;  %1230 = vmatprep.mubr.bf16.mxu1 %v1753_v0 }
 0x15c   : > { %1519 = vmatmul.mubr.msk.bf16.vlgmr.msra.gmra.mrb[40].mxu0 %vm379_vm0, %v2005_v33  ;;  %1521 = vmatmul.mubr.msk.bf16.vlgmr.msra.gmra.mrb[40].mxu1 %vm379_vm0, %v2005_v33 }
 0x15d   : > { %1187 = vmatprep.mubr.bf16.mxu0 %v1753_v0  ;;  %1240 = vmatprep.mubr.bf16.mxu1 %v1753_v0 }
 0x164   : > { %1520 = vmatmul.mubr.msk.bf16.gmra.mrb[44].mxu0 %vm379_vm0, %v2024_v9  ;;  %1522 = vmatmul.mubr.msk.bf16.gmra.mrb[44].mxu1 %vm379_vm0, %v2024_v9 }
 0x1ff   : > { %v861_v2 = vpop.f32.mrb[16].mxu0  ;;  %v914_v3 = vpop.f32.mrb[16].mxu1 }
 0x200   : > { %v863_v4 = vpop.f32.mrb[17].mxu0  ;;  %v1251_v5 = vmax.f32 %v861_v2, %v914_v3  ;;  %v916_v6 = vpop.f32.mrb[17].mxu1 }
 0x201   : > { %v865_v7 = vpop.f32.mrb[18].mxu0  ;;  %v1252_v8 = vmax.f32 %v863_v4, %v916_v6  ;;  %v918_v10 = vpop.f32.mrb[18].mxu1 }
 0x202   : > { %v867_v11 = vpop.f32.mrb[19].mxu0  ;;  %v1253_v33 = vmax.f32 %v865_v7, %v918_v10  ;;  %v920_v12 = vpop.f32.mrb[19].mxu1 }
 0x203   : > { %v1254_v13 = vmax.f32 %v867_v11, %v920_v12 }
 0x207   : > { %v871_v14 = vpop.f32.mrb[20].mxu0  ;;  %v924_v0 = vpop.f32.mrb[20].mxu1 }
 0x208   : > { %v873_v15 = vpop.f32.mrb[21].mxu0  ;;  %v1255_v16 = vmax.f32 %v871_v14, %v924_v0  ;;  %v926_v17 = vpop.f32.mrb[21].mxu1 }
 0x209   : > { %v875_v18 = vpop.f32.mrb[22].mxu0  ;;  %v1256_v19 = vmax.f32 %v873_v15, %v926_v17  ;;  %v928_v9 = vpop.f32.mrb[22].mxu1 }
 0x20a   : > { %v877_v20 = vpop.f32.mrb[23].mxu0  ;;  %v1257_v21 = vmax.f32 %v875_v18, %v928_v9  ;;  %v930_v22 = vpop.f32.mrb[23].mxu1 }
 0x20b   : > { %v1258_v23 = vmax.f32 %v877_v20, %v930_v22 }
 0x20f   : > { %v967_v24 = vpop.f32.mrb[24].mxu0  ;;  %v1020_v27 = vpop.f32.mrb[24].mxu1 }
 0x210   : > { %v1259_v25 = vmax.f32 %v1251_v5, %v967_v24  ;;  %v969_v26 = vpop.f32.mrb[25].mxu0  ;;  %v1022_v30 = vpop.f32.mrb[25].mxu1 }
 0x211   : > { %v1260_v28 = vmax.f32 %v1252_v8, %v969_v26  ;;  %v971_v29 = vpop.f32.mrb[26].mxu0  ;;  %v1024_v35 = vpop.f32.mrb[26].mxu1 }
 0x212   : > { %v1261_v31 = vmax.f32 %v1253_v33, %v971_v29  ;;  %v1267_v32 = vmax.f32 %v1259_v25, %v1020_v27  ;;  %v973_v34 = vpop.f32.mrb[27].mxu0  ;;  %v1026_v38 = vpop.f32.mrb[27].mxu1 }
 0x213   : > { %v1262_v36 = vmax.f32 %v1254_v13, %v973_v34  ;;  %v1268_v37 = vmax.f32 %v1260_v28, %v1022_v30  ;;  %v1314_v25 = vpop.permute.xlu1 %1313 }
 0x214   : > { %v1269_v39 = vmax.f32 %v1261_v31, %v1024_v35 }
 0x215   : > { %v1270_v42 = vmax.f32 %v1262_v36, %v1026_v38 }
 0x217   : > { %v977_v43 = vpop.f32.mrb[28].mxu0  ;;  %v1030_v46 = vpop.f32.mrb[28].mxu1 }
 0x218   : > { %v1263_v44 = vmax.f32 %v1255_v16, %v977_v43  ;;  %v979_v45 = vpop.f32.mrb[29].mxu0  ;;  %v1032_v49 = vpop.f32.mrb[29].mxu1 }
 0x219   : > { %v1264_v47 = vmax.f32 %v1256_v19, %v979_v45  ;;  %v981_v48 = vpop.f32.mrb[30].mxu0  ;;  %v1034_v40 = vpop.f32.mrb[30].mxu1 }
 0x21a   : > { %v1265_v50 = vmax.f32 %v1257_v21, %v981_v48  ;;  %v1271_v51 = vmax.f32 %v1263_v44, %v1030_v46  ;;  %v983_v52 = vpop.f32.mrb[31].mxu0  ;;  %v1036_v55 = vpop.f32.mrb[31].mxu1 }
 0x21b   : > { %v1266_v53 = vmax.f32 %v1258_v23, %v983_v52  ;;  %v1272_v54 = vmax.f32 %v1264_v47, %v1032_v49  ;;  %v1319_v46 = vpop.permute.xlu1 %1318 }
 0x21c   : > { %v1273_v56 = vmax.f32 %v1265_v50, %v1034_v40 }
 0x21d   : > { %v1274_v57 = vmax.f32 %v1266_v53, %v1036_v55 }
 0x21f   : > { %v1073_v58 = vpop.f32.mrb[32].mxu0  ;;  %v1126_v61 = vpop.f32.mrb[32].mxu1 }
 0x220   : > { %v1275_v59 = vmax.f32 %v1267_v32, %v1073_v58  ;;  %v1075_v60 = vpop.f32.mrb[33].mxu0  ;;  %v1128_v63 = vpop.f32.mrb[33].mxu1 }
 0x221   : > { %v1276_v62 = vmax.f32 %v1268_v37, %v1075_v60  ;;  %v1077_v41 = vpop.f32.mrb[34].mxu0  ;;  %v1130_v4 = vpop.f32.mrb[34].mxu1 }
 0x222   : > { %v1277_v1 = vmax.f32 %v1269_v39, %v1077_v41  ;;  %v1283_v2 = vmax.f32 %v1275_v59, %v1126_v61  ;;  %v1079_v3 = vpop.f32.mrb[35].mxu0  ;;  %v1132_v7 = vpop.f32.mrb[35].mxu1 }
 0x223   : > { %v1278_v5 = vmax.f32 %v1270_v42, %v1079_v3  ;;  %v1284_v6 = vmax.f32 %v1276_v62, %v1128_v63 }
 0x224   : > { %v1285_v8 = vmax.f32 %v1277_v1, %v1130_v4 }
 0x225   : > { %v1286_v10 = vmax.f32 %v1278_v5, %v1132_v7 }
 0x227   : > { %v1083_v11 = vpop.f32.mrb[36].mxu0  ;;  %v1136_v13 = vpop.f32.mrb[36].mxu1 }
 0x228   : > { %v1279_v33 = vmax.f32 %v1271_v51, %v1083_v11  ;;  %v1085_v12 = vpop.f32.mrb[37].mxu0  ;;  %v1138_v15 = vpop.f32.mrb[37].mxu1 }
 0x229   : > { %v1280_v14 = vmax.f32 %v1272_v54, %v1085_v12  ;;  %v1087_v0 = vpop.f32.mrb[38].mxu0  ;;  %v1140_v19 = vpop.f32.mrb[38].mxu1 }
 0x22a   : > { %v1281_v16 = vmax.f32 %v1273_v56, %v1087_v0  ;;  %v1287_v17 = vmax.f32 %v1279_v33, %v1136_v13  ;;  %v1089_v18 = vpop.f32.mrb[39].mxu0  ;;  %v1142_v21 = vpop.f32.mrb[39].mxu1 }
 0x22b   : > { %v1282_v9 = vmax.f32 %v1274_v57, %v1089_v18  ;;  %v1288_v20 = vmax.f32 %v1280_v14, %v1138_v15  ;;  %v1329_v11 = vpop.permute.xlu1 %1328 }
 0x22c   : > { %v1289_v22 = vmax.f32 %v1281_v16, %v1140_v19 }
 0x22d   : > { %v1290_v23 = vmax.f32 %v1282_v9, %v1142_v21 }
 0x22f   : > { %v1179_v24 = vpop.f32.mrb[40].mxu0  ;;  %v1232_v28 = vpop.f32.mrb[40].mxu1 }
 0x230   : > { %v1291_v26 = vmax.f32 %v1283_v2, %v1179_v24  ;;  %v1181_v27 = vpop.f32.mrb[41].mxu0  ;;  %v1234_v31 = vpop.f32.mrb[41].mxu1 }
 0x231   : > { %v1292_v29 = vmax.f32 %v1284_v6, %v1181_v27  ;;  %v1183_v30 = vpop.f32.mrb[42].mxu0  ;;  %v1236_v36 = vpop.f32.mrb[42].mxu1 }
 0x232   : > { %v1293_v32 = vmax.f32 %v1285_v8, %v1183_v30  ;;  %v1299_v34 = vmax.f32 %v1291_v26, %v1232_v28  ;;  %v1185_v35 = vpop.f32.mrb[43].mxu0  ;;  %v1238_v39 = vpop.f32.mrb[43].mxu1 }
 0x233   : > { %v1294_v37 = vmax.f32 %v1286_v10, %v1185_v35  ;;  %v1300_v38 = vmax.f32 %v1292_v29, %v1234_v31  ;;  %v1324_v2 = vpop.permute.xlu0 %1323 }
 0x234   : > { %v1331_v42 = vadd.f32 %v1314_v25, %v1299_v34  ;;  %v1301_v43 = vmax.f32 %v1293_v32, %v1236_v36 }
 0x235   : > { %v1332_v44 = vadd.f32 %v1314_v25, %v1300_v38  ;;  %v1302_v45 = vmax.f32 %v1294_v37, %v1238_v39 }
 0x236   : > { %v1339_v47 = vmul.f32 0.1, %v1331_v42  ;;  %v1333_v48 = vadd.f32 %v1319_v46, %v1301_v43 }
 0x237   : > { %v1340_v49 = vmul.f32 0.1, %v1332_v44  ;;  %v1334_v50 = vadd.f32 %v1319_v46, %v1302_v45  ;;  %v1189_v51 = vpop.f32.mrb[44].mxu0  ;;  %v1242_v55 = vpop.f32.mrb[44].mxu1 }
 0x238   : > { %v1347_v52 = vmax.f32 %v1331_v42, %v1339_v47  ;;  %v1341_v40 = vmul.f32 0.1, %v1333_v48  ;;  %v1295_v53 = vmax.f32 %v1287_v17, %v1189_v51  ;;  %v1191_v54 = vpop.f32.mrb[45].mxu0  ;;  %v1244_v60 = vpop.f32.mrb[45].mxu1 }
 0x239   : > { %v1348_v56 = vmax.f32 %v1332_v44, %v1340_v49  ;;  %v1342_v57 = vmul.f32 0.1, %v1334_v50  ;;  %v1296_v58 = vmax.f32 %v1288_v20, %v1191_v54  ;;  %v1193_v59 = vpop.f32.mrb[46].mxu0  ;;  %v1246_v1 = vpop.f32.mrb[46].mxu1 }
 0x23a   : > { %1355 = vst [vmem:[%s2078_s16] sm:$0xff] %v1347_v52  ;;  %v1349_v61 = vmax.f32 %v1333_v48, %v1341_v40  ;;  %v1297_v62 = vmax.f32 %v1289_v22, %v1193_v59  ;;  %v1303_v41 = vmax.f32 %v1295_v53, %v1242_v55  ;;  %v1195_v63 = vpop.f32.mrb[47].mxu0  ;;  %v1248_v6 = vpop.f32.mrb[47].mxu1 }
 0x23b   : > { %1356 = vst [vmem:[%s2078_s16 + $0x8] sm:$0xff] %v1348_v56  ;;  %v1350_v3 = vmax.f32 %v1334_v50, %v1342_v57  ;;  %v1298_v4 = vmax.f32 %v1290_v23, %v1195_v63  ;;  %v1304_v5 = vmax.f32 %v1296_v58, %v1244_v60 }
 0x23c   : > { %1357 = vst [vmem:[%s2078_s16 + $0x10] sm:$0xff] %v1349_v61  ;;  %v1335_v7 = vadd.f32 %v1324_v2, %v1303_v41  ;;  %v1305_v8 = vmax.f32 %v1297_v62, %v1246_v1 }
 0x23d   : > { %1358 = vst [vmem:[%s2078_s16 + $0x18] sm:$0xff] %v1350_v3  ;;  %v1336_v10 = vadd.f32 %v1324_v2, %v1304_v5  ;;  %v1306_v33 = vmax.f32 %v1298_v4, %v1248_v6 }
 0x23e   : > { %v1343_v12 = vmul.f32 0.1, %v1335_v7  ;;  %v1337_v13 = vadd.f32 %v1329_v11, %v1305_v8 }
 0x23f   : > { %v1344_v14 = vmul.f32 0.1, %v1336_v10  ;;  %v1338_v0 = vadd.f32 %v1329_v11, %v1306_v33 }
 0x240   : > { %v1351_v15 = vmax.f32 %v1335_v7, %v1343_v12  ;;  %v1345_v16 = vmul.f32 0.1, %v1337_v13 }
 0x241   : > { %v1352_v17 = vmax.f32 %v1336_v10, %v1344_v14  ;;  %v1346_v18 = vmul.f32 0.1, %v1338_v0 }
 0x242   : > { %1359 = vst [vmem:[%s2078_s16 + $0x20] sm:$0xff] %v1351_v15  ;;  %v1353_v19 = vmax.f32 %v1337_v13, %v1345_v16 }
 0x243   : > { %1360 = vst [vmem:[%s2078_s16 + $0x28] sm:$0xff] %v1352_v17  ;;  %v1354_v9 = vmax.f32 %v1338_v0, %v1346_v18 }
 0x244   : > { %1361 = vst [vmem:[%s2078_s16 + $0x30] sm:$0xff] %v1353_v19 }
 0x245   : > { %1362 = vst [vmem:[%s2078_s16 + $0x38] sm:$0xff] %v1354_v9 }
 0x246   : > { %1662 = shalt.err (!%p1659_p4)
}
 0x247   : > { %s1663_s11 = scalar_lea.hbm %s2091_s10, 1024  ;;  %s1667_s16 = scalar_lea.hbm %s2153_s5, 4096 }
 0x248   : > { %p1664_p6 = scmp.ne.s32.totalorder %s2091_s10, %s1663_s11  ;;  %p1668_p1 = scmp.lt.u32.totalorder %s2091_s10, %s2153_s5 }
 0x249   : > { %p1669_p3 = scmp.lt.u32.totalorder %s1667_s16, %s1663_s11  ;;  %p1671_p8 = scmp.lt.u32.totalorder %s1663_s11, %s2091_s10 }
 0x24a   : > { %p1665_p7 = pnand %p1664_p6, %p2165_p9 }
 0x24b   : > { %p1670_p5 = por %p1669_p3, %p1668_p1 }
 0x24c   : > { %p1666_p10 = pneg %p1665_p7 }
 0x24d   : > { %p1672_p12 = por %p1671_p8, %p1670_p5 }
 0x24f   : > { %p1673_p0 = pnand %p1672_p12, %p1666_p10 }
 0x251   : > { %1676 = shalt.err (!%p1673_p0)
}
 0x252   : > { %s1755_s27 = smov 256   ;;  %s1756_s13 = smov 512  }
 0x253   : > { %s1757_s8 = smov 16  }
 0x254   : > { %1531 = dma.vmem_to_hbm [thread:$0]  (%p2165_p9), %s2085_s22, 1024, %s2091_s10, %s1364_s28, %s1755_s27, %s1756_s13, %s1757_s8  }
 0x255 PF: > { %s2166_s6 = sld [smem:[#allocation8_spill]]  ;;  %p1542_p11 = scmp.ge.s32.totalorder %s1747_s25, 2 }
 0x256   : > { %p2167_p13 = scmp.ne.s32.totalorder %s2162_s12, 0 }
 0x258   : > { %p1538_p2 = pnand %p1542_p11, %p2167_p13 }
 0x25b   : > { %s1394_s30 = sand.u32 1, %s2166_s6  }
 0x25c   : > { %s1395_s15 = scalar_lea.sflag [#allocation4], %s1394_s30 }
 0x25d   : > { %1714 = dma.done.wait (!%p1538_p2), %s1395_s15, 1024  }
 0x25e   : > { %1716 = vsyncadd (!%p1538_p2), %s1395_s15, 4294966272  ;;  %s21_s25 = sadd.s32 1, %s1747_s25   ;;  %s2168_s9 = sld [smem:[#allocation9_spill]] }
 0x25f   : > { %p18_p4 = scmp.ge.s32.totalorder %s21_s25, 6   ;;  %s2169_s18 = smov %s1723_s19 }
 0x260   : > { %s2170_s19 = smov %s1727_s20  ;;  %s2171_s20 = smov %s1866_s14 }
 0x261   : > { %s2172_s21 = smov %s1739_s23  ;;  %s2173_s22 = smov %s1743_s24 }
 0x262   : > { %s2175_s24 = smov %s2181_s29  ;;  %20 = sbr.rel (!%p18_p4) target bundleno = 7 (0x7), region = 85 }
 0x264   : > { %s2174_s23 = smov %s2168_s9 }
 0x269   :  { %1400 = vsyncpa [#allocation3], 1 }
 0x26a   :  { %1402 = vsyncpa [#allocation3 + $0x1], 1 }
 0x26b   :  { %1403 = vsyncpa [#allocation4], 1 }
 0x26c   :  { %1405 = vsyncpa [#allocation4 + $0x1], 1 }

</bundles_post_ra>
